<compile_context>
chip_gen: v7x
topology: tpu7x:2x2x1
jax: 0.10.0
libtpu: 0.0.40
codegen_flags: <defaults>
</compile_context>

<pallas_src>
import functools

import jax
import jax.numpy as jnp
from jax.experimental import pallas as pl
from jax.experimental.pallas import tpu as pltpu

GAMMA = 1.5


def _round_up(x, m):
    return ((x + m - 1) // m) * m


def _focal_loss_kernel(logits_ref, targets_ref, out_ref, *, gamma, n_total,
                       tile_n, tiles_per_split):
    p = pl.program_id(0)   # parallel split (TensorCore) index
    i = pl.program_id(1)   # batch-tile index within the split (reduction axis)

    @pl.when(i == 0)
    def _():
        out_ref[0, 0] = jnp.float32(0.0)

    logits = logits_ref[...].astype(jnp.float32)        # (tile_n, C)
    tgt = targets_ref[...]                              # (tile_n, 1) int32
    tn, c = logits.shape

    # Valid-row mask for the (possibly padded / duplicated) last tiles.
    row_start = (p * tiles_per_split + i) * tile_n
    row_ids = jax.lax.broadcasted_iota(jnp.int32, (tn, 1), 0) + row_start
    valid = row_ids < n_total                           # (tile_n, 1) bool

    # Numerically-stable CE with the target-logit gather fused into the
    # shifted logits (the row_max term cancels exactly).
    row_max = jnp.max(logits, axis=-1, keepdims=True)   # (tile_n, 1)
    shifted = logits - row_max
    class_ids = jax.lax.broadcasted_iota(jnp.int32, (tn, c), 1)
    tgt_shifted = jnp.sum(jnp.where(class_ids == tgt, shifted, 0.0),
                          axis=-1, keepdims=True)       # (tile_n, 1)
    ce = jnp.log(jnp.sum(jnp.exp(shifted), axis=-1, keepdims=True)) - tgt_shifted

    pt = jnp.exp(-ce)
    w = jnp.maximum(1.0 - pt, 0.0)                      # clamp: no NaN if pt>1
    if gamma == 1.5:
        wg = w * jnp.sqrt(w)                            # w**1.5 without pow
    else:
        wg = w ** gamma
    focal = jnp.where(valid, wg * ce, 0.0)              # (tile_n, 1)

    out_ref[0, 0] += jnp.sum(focal)


def focal_loss(logits, targets, gamma=GAMMA, tile_n=None, num_splits=2):
    """Pallas TPU implementation of FocalLoss.forward (returns scalar mean)."""
    n, c = logits.shape
    targets2d = targets.astype(jnp.int32).reshape(n, 1)

    if tile_n is None:
        # Largest batch tile that comfortably fits the scoped-VMEM limits of
        # every generation (v5e 16 MiB default scope, v7x 64 MiB physical),
        # rounded to the sublane multiple of 8.
        tile_n = min(512, _round_up(n, 8))
    tile_n = _round_up(tile_n, 8)

    num_tiles = pl.cdiv(n, tile_n)
    num_splits = max(1, min(num_splits, num_tiles))
    tiles_per_split = pl.cdiv(num_tiles, num_splits)

    def block_idx(p, i):
        # Clamp so that the (possibly duplicated) trailing tiles of the last
        # split never DMA out of bounds; their rows are masked in-kernel.
        t = jnp.minimum(p * tiles_per_split + i, num_tiles - 1)
        return (t, 0)

    kernel = functools.partial(
        _focal_loss_kernel, gamma=gamma, n_total=n, tile_n=tile_n,
        tiles_per_split=tiles_per_split)

    partial_sums = pl.pallas_call(
        kernel,
        out_shape=jax.ShapeDtypeStruct((num_splits, 1), jnp.float32),
        grid=(num_splits, tiles_per_split),
        in_specs=[
            pl.BlockSpec((tile_n, c), block_idx),       # logits (native dtype)
            pl.BlockSpec((tile_n, 1), block_idx),       # targets (int32)
        ],
        out_specs=pl.BlockSpec((1, 1), lambda p, i: (p, 0),
                               memory_space=pltpu.SMEM),
        compiler_params=pltpu.CompilerParams(
            dimension_semantics=("parallel", "arbitrary"),
            vmem_limit_bytes=32 * 1024 * 1024,
        ),
    )(logits, targets2d)

    return jnp.sum(partial_sums) / jnp.float32(n)


def _focal_loss_ref(logits, targets, gamma=GAMMA):
    """Pure-JAX reference mirroring torch F.cross_entropy + focal weighting."""
    logits = logits.astype(jnp.float32)
    logz = jax.nn.logsumexp(logits, axis=-1)
    tgt_logit = jnp.take_along_axis(
        logits, targets.astype(jnp.int32)[:, None], axis=-1)[:, 0]
    ce = logz - tgt_logit
    pt = jnp.exp(-ce)
    return jnp.mean((1.0 - pt) ** gamma * ce)


if __name__ == "__main__":
    key = jax.random.PRNGKey(0)
    k1, k2, k3, k4 = jax.random.split(key, 4)

    # Small case (single tile, single split).
    N, C = 8, 4
    logits = jax.random.normal(k1, (N, C), dtype=jnp.float32)
    targets = jax.random.randint(k2, (N,), 0, C, dtype=jnp.int32)
    loss = focal_loss(logits, targets)
    jax.block_until_ready(loss)
    ref = _focal_loss_ref(logits, targets)
    assert jnp.allclose(loss, ref, atol=1e-5, rtol=1e-5), (loss, ref)

    # Non-divisible batch with a forced small tile: exercises the multi-tile
    # grid, the 2-way parallel split, tile clamping and the partial-row mask.
    N2, C2 = 37, 5
    logits2 = jax.random.normal(k3, (N2, C2), dtype=jnp.float32)
    targets2 = jax.random.randint(k4, (N2,), 0, C2, dtype=jnp.int32)
    loss2 = focal_loss(logits2, targets2, tile_n=8, num_splits=2)
    jax.block_until_ready(loss2)
    ref2 = _focal_loss_ref(logits2, targets2)
    assert jnp.allclose(loss2, ref2, atol=1e-5, rtol=1e-5), (loss2, ref2)

    print("KERNEL_OK")
</pallas_src>

<mosaic_0001>
module attributes {stable_mosaic.version = 11 : i64} {
  func.func @_focal_loss_kernel(%arg0: i32, %arg1: i32, %arg2: memref<8x4xf32, #tpu.memory_space<vmem>>, %arg3: memref<8x1xi32, #tpu.memory_space<vmem>>, %arg4: memref<1x1xf32, #tpu.memory_space<smem>>) attributes {dimension_semantics = [#tpu.dimension_semantics<parallel>, #tpu.dimension_semantics<arbitrary>], iteration_bounds = array<i64: 1, 1>, scalar_prefetch = 0 : i64, scratch_operands = 0 : i64, tpu.core_type = #tpu.core_type<tc>, window_params = [{transform_indices = @transform_0, window_bounds = array<i64: 8, 4>}, {transform_indices = @transform_1, window_bounds = array<i64: 8, 1>}, {transform_indices = @transform_2, window_bounds = array<i64: 1, 1>}]} {
    %c0_i32 = arith.constant 0 : i32
    %0 = arith.cmpi eq, %arg1, %c0_i32 : i32
    %1 = arith.extui %0 : i1 to i32
    %c0_i32_0 = arith.constant 0 : i32
    %2 = arith.cmpi ne, %1, %c0_i32_0 : i32
    scf.if %2 {
      %cst_17 = arith.constant 0.000000e+00 : f32
      %c0_18 = arith.constant 0 : index
      %c0_19 = arith.constant 0 : index
      %48 = memref.load %arg4[%c0_18, %c0_19] : memref<1x1xf32, #tpu.memory_space<smem>>
      memref.store %cst_17, %arg4[%c0_18, %c0_19] : memref<1x1xf32, #tpu.memory_space<smem>>
    } else {
    }
    %c0 = arith.constant 0 : index
    %c0_1 = arith.constant 0 : index
    %3 = vector.load %arg2[%c0, %c0_1] : memref<8x4xf32, #tpu.memory_space<vmem>>, vector<8x4xf32>
    %c0_2 = arith.constant 0 : index
    %c0_3 = arith.constant 0 : index
    %4 = vector.load %arg3[%c0_2, %c0_3] : memref<8x1xi32, #tpu.memory_space<vmem>>, vector<8x1xi32>
    %c1_i32 = arith.constant 1 : i32
    %5 = arith.muli %arg0, %c1_i32 : i32
    %6 = arith.addi %5, %arg1 : i32
    %c8_i32 = arith.constant 8 : i32
    %7 = arith.muli %6, %c8_i32 : i32
    %8 = tpu.iota {dimensions = array<i32: 0>} : vector<8x1xi32>
    %9 = vector.broadcast %7 : i32 to vector<8x1xi32>
    %10 = arith.addi %8, %9 : vector<8x1xi32>
    %c8_i32_4 = arith.constant 8 : i32
    %11 = vector.broadcast %c8_i32_4 : i32 to vector<8x1xi32>
    %12 = arith.cmpi slt, %10, %11 : vector<8x1xi32>
    %cst = arith.constant dense<0xFF800000> : vector<8xf32>
    %13 = vector.multi_reduction <maximumf>, %3, %cst [1] : vector<8x4xf32> to vector<8xf32>
    %14 = vector.shape_cast %13 : vector<8xf32> to vector<8x1xf32>
    %15 = vector.broadcast %14 : vector<8x1xf32> to vector<8x4xf32>
    %16 = arith.subf %3, %15 : vector<8x4xf32>
    %17 = tpu.iota {dimensions = array<i32: 1>} : vector<8x4xi32>
    %18 = vector.broadcast %4 : vector<8x1xi32> to vector<8x4xi32>
    %19 = arith.cmpi eq, %17, %18 : vector<8x4xi32>
    %cst_5 = arith.constant 0.000000e+00 : f32
    %20 = vector.broadcast %cst_5 : f32 to vector<8x4xf32>
    %21 = arith.select %19, %16, %20 : vector<8x4xi1>, vector<8x4xf32>
    %cst_6 = arith.constant dense<0.000000e+00> : vector<8xf32>
    %22 = vector.multi_reduction <add>, %21, %cst_6 [1] : vector<8x4xf32> to vector<8xf32>
    %23 = vector.shape_cast %22 : vector<8xf32> to vector<8x1xf32>
    %24 = math.exp %16 : vector<8x4xf32>
    %cst_7 = arith.constant dense<0.000000e+00> : vector<8xf32>
    %25 = vector.multi_reduction <add>, %24, %cst_7 [1] : vector<8x4xf32> to vector<8xf32>
    %26 = vector.shape_cast %25 : vector<8xf32> to vector<8x1xf32>
    %27 = math.log %26 : vector<8x1xf32>
    %28 = arith.subf %27, %23 : vector<8x1xf32>
    %cst_8 = arith.constant 0.000000e+00 : f32
    %29 = vector.broadcast %cst_8 : f32 to vector<8x1xf32>
    %30 = arith.subf %29, %28 : vector<8x1xf32>
    %31 = math.exp %30 : vector<8x1xf32>
    %cst_9 = arith.constant 1.000000e+00 : f32
    %32 = vector.broadcast %cst_9 : f32 to vector<8x1xf32>
    %33 = arith.subf %32, %31 : vector<8x1xf32>
    %cst_10 = arith.constant 0.000000e+00 : f32
    %34 = vector.broadcast %cst_10 : f32 to vector<8x1xf32>
    %35 = arith.maximumf %33, %34 : vector<8x1xf32>
    %36 = math.sqrt %35 : vector<8x1xf32>
    %37 = arith.mulf %35, %36 : vector<8x1xf32>
    %38 = arith.mulf %37, %28 : vector<8x1xf32>
    %cst_11 = arith.constant 0.000000e+00 : f32
    %39 = vector.broadcast %cst_11 : f32 to vector<8x1xf32>
    %40 = arith.select %12, %38, %39 : vector<8x1xi1>, vector<8x1xf32>
    %c0_12 = arith.constant 0 : index
    %c0_13 = arith.constant 0 : index
    %41 = memref.load %arg4[%c0_12, %c0_13] : memref<1x1xf32, #tpu.memory_space<smem>>
    %42 = vector.shape_cast %40 : vector<8x1xf32> to vector<1x8x1xf32>
    %cst_14 = arith.constant dense<0.000000e+00> : vector<1xf32>
    %43 = vector.multi_reduction <add>, %42, %cst_14 [1, 2] : vector<1x8x1xf32> to vector<1xf32>
    %44 = vector.shape_cast %43 : vector<1xf32> to vector<1x1x1xf32>
    %45 = vector.extract %44[0, 0, 0] : f32 from vector<1x1x1xf32>
    %46 = arith.addf %41, %45 : f32
    %c0_15 = arith.constant 0 : index
    %c0_16 = arith.constant 0 : index
    %47 = memref.load %arg4[%c0_15, %c0_16] : memref<1x1xf32, #tpu.memory_space<smem>>
    memref.store %46, %arg4[%c0_15, %c0_16] : memref<1x1xf32, #tpu.memory_space<smem>>
    return
  }
  func.func @transform_0(%arg0: i32, %arg1: i32) -> (i32, i32) {
    %c1_i32 = arith.constant 1 : i32
    %0 = arith.muli %arg0, %c1_i32 : i32
    %1 = arith.addi %0, %arg1 : i32
    %c0_i32 = arith.constant 0 : i32
    %2 = arith.minsi %1, %c0_i32 : i32
    %c0_i32_0 = arith.constant 0 : i32
    %c0_i32_1 = arith.constant 0 : i32
    return %2, %c0_i32_0 : i32, i32
  }
  func.func @transform_1(%arg0: i32, %arg1: i32) -> (i32, i32) {
    %c1_i32 = arith.constant 1 : i32
    %0 = arith.muli %arg0, %c1_i32 : i32
    %1 = arith.addi %0, %arg1 : i32
    %c0_i32 = arith.constant 0 : i32
    %2 = arith.minsi %1, %c0_i32 : i32
    %c0_i32_0 = arith.constant 0 : i32
    %c0_i32_1 = arith.constant 0 : i32
    return %2, %c0_i32_0 : i32, i32
  }
  func.func @transform_2(%arg0: i32, %arg1: i32) -> (i32, i32) {
    %c0_i32 = arith.constant 0 : i32
    %c0_i32_0 = arith.constant 0 : i32
    return %arg0, %c0_i32 : i32, i32
  }
}

</mosaic_0001>

<bundles_post_ra>
// kernel: tpu_custom_call.1
= control target key start
LH: loop header
LB: loop body
LE: loop exit
PB: predicated region body
PF: predicated region fallthrough
CT: control target
= control target key end

     0   :  { %vm81_vm0 = vcmask 31744   ;;  %s223_s0 = inlined_call_operand.vmem [shape: f32[8,4], index: 0, kind: input, shape index: {}]   ;;  %s224_s1 = inlined_call_operand.vmem [shape: s32[8,1], index: 1, kind: input, shape index: {}]   ;;  %s225_s2 = inlined_call_operand.hbm [shape: f32[1,1], index: 2, kind: output, shape index: {}]  }
   0x1   :  { %v72_v0 = vld [vmem:[%s223_s0] sm:$0xff] }
   0x2   :  { %7 = vsyncpa [#allocation3], 0  ;;  %v82_v1 = vsel %vm81_vm0, %v72_v0, -inf  ;;  %v185_v2 = vmov 0   ;;  %v73_v3 = vld [vmem:[%s224_s1] sm:$0xff]  ;;  %v86_v7 = vlaneseq  ;;  %vm120_vm4 = vcmask 7168  }
   0x3   :  { %164 = vset.pattern.permute.xlu0 %v185_v2  ;;  %s173_s14 = scalar_lea.hbm %s225_s2, 16 }
   0x4   :  { %83 = vmax.xlane.f32.xlu0 %v82_v1  ;;  %v87_v8 = vand.u32 127, %v86_v7  ;;  %p174_p0 = scmp.ne.s32.totalorder %s225_s2, %s173_s14  ;;  %p177_p1 = scmp.lt.u32.totalorder %s173_s14, %s225_s2 }
   0x6   :  { %p179_p2 = pnand %p177_p1, %p174_p0 }
  0x1a   :  { %89 = vperm.xlu0 %164, %v73_v3  }
  0x91   :  { %v84_v4 = vpop.xlane.xlu0 %83 }
  0x92   :  { %v85_v5 = vsub.f32 %v72_v0, %v84_v4 }
  0x94   :  { %v96_v6 = vmul.f32 1.442695, %v85_v5 }
  0x96   :  { %165 = vpow2.f32 %v96_v6 }
  0x99   :  { %v90_v9 = vpop.permute.xlu0 %89 }
  0x9a   :  { %vm91_vm1 = vcmp.eq.s32.totalorder %v87_v8, %v90_v9 }
  0x9b   :  { %v92_v12 = vsel %vm91_vm1, %v85_v5, 0.0 }
  0x9c   :  { %v93_v13 = vsel %vm81_vm0, %v92_v12, 0.0 }
  0xa0   :  { %v166_v10 = vpop.eup %165 }
  0xa1   :  { %v98_v11 = vsel %vm81_vm0, %v166_v10, 0.0 }
  0xa2   :  { %99 = vadd.xlane.f32.xlu1 %v98_v11 }
  0xa6   :  { %94 = vadd.xlane.f32.xlu1 %v93_v13 }
 0x12f   :  { %v100_v14 = vpop.xlane.xlu1 %99 }
 0x130   :  { %167 = vlog2.f32 %v100_v14 }
 0x133   :  { %v95_v17 = vpop.xlane.xlu1 %94 }
 0x13a   :  { %v168_v15 = vpop.eup %167 }
 0x13b   :  { %v102_v16 = vmul.f32 0.6931472, %v168_v15 }
 0x13d   :  { %v103_v18 = vsub.f32 %v102_v16, %v95_v17 }
 0x13f   :  { %v104_v19 = vsub.f32 0.0, %v103_v18 }
 0x141   :  { %v105_v20 = vmul.f32 1.442695, %v104_v19 }
 0x143   :  { %169 = vpow2.f32 %v105_v20 }
 0x14d   :  { %v170_v21 = vpop.eup %169 }
 0x14e   :  { %v107_v22 = vsub.f32 1.0, %v170_v21 }
 0x150   :  { %v108_v23 = vmax.f32 %v107_v22, 0.0 }
 0x152   :  { %171 = vrsqrt.f32 %v108_v23  ;;  %vm111_vm2 = vcmp.eq.f32.partialorder %v108_v23, inf  ;;  %v114_v26 = vand.u32 2147483648, %v108_v23  ;;  %vm113_vm3 = vcmp.eq.f32.partialorder %v108_v23, 0.0 }
 0x15c   :  { %v172_v24 = vpop.eup %171 }
 0x15d   :  { %v110_v25 = vmul.f32 %v172_v24, %v108_v23 }
 0x15f   :  { %v112_v27 = vsel %vm111_vm2, %v108_v23, %v110_v25 }
 0x160   :  { %v115_v28 = vsel %vm113_vm3, %v114_v26, %v112_v27 }
 0x161   :  { %v116_v29 = vmul.f32 %v115_v28, %v108_v23 }
 0x163   :  { %v117_v30 = vmul.f32 %v116_v29, %v103_v18 }
 0x165   :  { %v121_v31 = vsel %vm120_vm4, %v117_v30, 0.0 }
 0x166   :  { %122 = vadd.xlane.f32.xlu1 %v121_v31 }
 0x1f3   :  { %v123_v32 = vpop.xlane.xlu1 %122 }
 0x1f4   :  { %v124_v33 = vrot.slane %v123_v32, 4 }
 0x1f6   :  { %v125_v34 = vadd.f32 %v124_v33, %v123_v32 }
 0x1f8   :  { %v126_v35 = vrot.slane %v125_v34, 2 }
 0x1fa   :  { %v127_v36 = vadd.f32 %v126_v35, %v125_v34 }
 0x1fc   :  { %v128_v37 = vrot.slane %v127_v36, 1 }
 0x1fe   :  { %v129_v38 = vadd.f32 %v128_v37, %v127_v36 }
 0x200   :  { %159 = vpush %v129_v38 }
 0x231   :  { %s160_s0 = spop %159 }
 0x232   :  { %133 = sst [smem:[#allocation2]] %s160_s0 }
 0x233   :  { %182 = shalt.err (!%p179_p2)
}
 0x234   :  { %s186_s19 = smov [#allocation2]  }
 0x235   :  { %141 = dma.smem_to_hbm %s186_s19, 16, %s225_s2, [#allocation3]  }
 0x236   :  { %183 = dma.done.wait [#allocation3], 16  }
 0x237   :  { %184 = vsyncadd [#allocation3], 4294967280 }
 0x238   :  { %145 = sfence }
 0x239   :  { %146 = vsyncpa [#allocation3], 1 }

</bundles_post_ra>
